<compile_context>
chip_gen: v7x
topology: tpu7x:2x2x1
jax: 0.10.0
libtpu: 0.0.40
codegen_flags: <defaults>
</compile_context>

<pallas_src>
import math

import jax
import jax.numpy as jnp
from jax import lax
from jax.experimental import pallas as pl
from jax.experimental.pallas import tpu as pltpu

RHO = 0.1
LOOP = int(1 / RHO)  # = 10


def _round_up(x, m):
    return ((x + m - 1) // m) * m


# ----------------------------------------------------------------------------
# Pallas kernel: tiled masked linear  (out[m,n] = sum_k x[m,k] * (w*mask)[n,k])
# ----------------------------------------------------------------------------
def _dropconnect_linear_kernel(idx_ref, x_ref, w_ref, m_ref, b_ref, o_ref,
                               acc_ref):
    # idx_ref: SMEM scalar-prefetch (consumed by the index_maps; unused here).
    # x_ref: (tm, tk), w_ref/m_ref: (tn, tk), b_ref: (1, tn),
    # o_ref: (tm, tn), acc_ref: (tm, tn) f32 scratch.
    del idx_ref
    k = pl.program_id(2)

    @pl.when(k == 0)
    def _init():
        acc_ref[...] = jnp.zeros_like(acc_ref)

    # int8 {0,1} mask -> weight dtype; cheap VPU work hidden under the MXU.
    masked_w = w_ref[...] * m_ref[...].astype(w_ref.dtype)

    # Contract over the IN axis of both operands: no transpose materialized.
    acc_ref[...] += lax.dot_general(
        x_ref[...], masked_w,
        dimension_numbers=(((1,), (1,)), ((), ())),
        preferred_element_type=jnp.float32)

    @pl.when(k == pl.num_programs(2) - 1)
    def _finalize():
        o_ref[...] = (acc_ref[...] + b_ref[...]).astype(o_ref.dtype)


def dropconnect_linear(x, weight, masks, bias, index, *, tm=None, tn=None,
                       tk=None):
    """Eval-mode forward of DropConnectLinear: F.linear(x, weight*masks[index], bias)."""
    B, K = x.shape
    N = weight.shape[0]

    # Tile sizes: lane-dense N/K tiles (multiples of 128), sublane-aligned M.
    if tm is None:
        tm = min(128, _round_up(B, 8))
    if tn is None:
        tn = min(256, _round_up(N, 128))
    if tk is None:
        tk = min(256, _round_up(K, 128))

    Mp = _round_up(B, tm)
    Np = _round_up(N, tn)
    Kp = _round_up(K, tk)

    # Zero-padding: padded K columns contribute 0 to the dot; padded M rows /
    # N columns are sliced off below.
    xp = jnp.pad(x, ((0, Mp - B), (0, Kp - K)))
    wp = jnp.pad(weight, ((0, Np - N), (0, Kp - K)))
    mp = jnp.pad(masks, ((0, 0), (0, Np - N), (0, Kp - K)))
    bp = jnp.pad(bias.reshape(1, N), ((0, 0), (0, Np - N)))

    idx = jnp.asarray(index, dtype=jnp.int32).reshape(1)

    grid = (Mp // tm, Np // tn, Kp // tk)

    grid_spec = pltpu.PrefetchScalarGridSpec(
        num_scalar_prefetch=1,
        grid=grid,
        in_specs=[
            pl.BlockSpec((tm, tk), lambda m, n, k, idx_ref: (m, k)),      # x
            pl.BlockSpec((tn, tk), lambda m, n, k, idx_ref: (n, k)),      # w
            pl.BlockSpec((None, tn, tk),                                   # masks[index]
                         lambda m, n, k, idx_ref: (idx_ref[0], n, k)),
            pl.BlockSpec((1, tn), lambda m, n, k, idx_ref: (0, n)),        # bias
        ],
        out_specs=pl.BlockSpec((tm, tn), lambda m, n, k, idx_ref: (m, n)),
        scratch_shapes=[pltpu.VMEM((tm, tn), jnp.float32)],
    )

    flops = 2 * Mp * Np * Kp
    bytes_accessed = (xp.size * xp.dtype.itemsize
                      + wp.size * wp.dtype.itemsize
                      + Np * Kp * mp.dtype.itemsize      # only the selected mask slice
                      + bp.size * bp.dtype.itemsize
                      + Mp * Np * x.dtype.itemsize)

    out = pl.pallas_call(
        _dropconnect_linear_kernel,
        out_shape=jax.ShapeDtypeStruct((Mp, Np), x.dtype),
        grid_spec=grid_spec,
        compiler_params=pltpu.CompilerParams(
            dimension_semantics=("parallel", "parallel", "arbitrary"),
            vmem_limit_bytes=32 * 1024 * 1024,   # headroom even on v7x (64 MiB phys)
        ),
        cost_estimate=pl.CostEstimate(
            flops=flops, transcendentals=0, bytes_accessed=bytes_accessed),
    )(idx, xp, wp, mp, bp)

    return out[:B, :N]


# ----------------------------------------------------------------------------
# Deterministic parameter / mask construction (mirrors the PyTorch __init__)
# ----------------------------------------------------------------------------
def make_structured_masks(key, out_features, in_features, rho=RHO):
    """Reproduces mask(): a random permutation of all out*in weight slots is
    partitioned into 1/rho disjoint chunks; mask k zeroes exactly chunk k.
    Stored as int8 (exact 0/1) to shrink HBM footprint / per-call DMA."""
    n = out_features * in_features
    loop = int(1 / rho)
    chunk = int(rho * n)
    perm = jax.random.permutation(key, n)
    masks = jnp.ones((loop, n), dtype=jnp.int8)
    for k in range(loop):
        zero_idx = perm[k * chunk:(k + 1) * chunk]
        masks = masks.at[k, zero_idx].set(0)
    return masks.reshape(loop, out_features, in_features)


def init_params(key, in_features, out_features):
    """Kaiming-uniform(a=sqrt(5)) weight + uniform(-1/sqrt(fan_in)) bias,
    matching nn.Linear.reset_parameters (deterministic via JAX PRNG)."""
    kw, kb = jax.random.split(key)
    gain = math.sqrt(2.0 / (1.0 + 5.0))              # a = sqrt(5)
    bound_w = gain * math.sqrt(3.0 / in_features)    # kaiming_uniform bound
    weight = jax.random.uniform(kw, (out_features, in_features),
                                minval=-bound_w, maxval=bound_w,
                                dtype=jnp.float32)
    bound_b = 1.0 / math.sqrt(in_features)
    bias = jax.random.uniform(kb, (out_features,),
                              minval=-bound_b, maxval=bound_b,
                              dtype=jnp.float32)
    return weight, bias


# ----------------------------------------------------------------------------
# Main
# ----------------------------------------------------------------------------
if __name__ == "__main__":
    # TODO(synk): training-mode branch (fresh Bernoulli mask each call) not
    # implemented in-kernel; only the eval-mode structured-mask branch is.
    # LeNet-5-like fc layer: 400 -> 120, modest batch; exercises padding
    # (120 -> 128 lanes, 400 -> 512 K) and the multi-step K reduction.
    batch, in_features, out_features = 32, 400, 120
    index = 3

    root = jax.random.PRNGKey(0)
    k_x, k_m, k_p = jax.random.split(root, 3)

    x = jax.random.normal(k_x, (batch, in_features), dtype=jnp.float32)
    masks = make_structured_masks(k_m, out_features, in_features, RHO)
    weight, bias = init_params(k_p, in_features, out_features)

    out = dropconnect_linear(x, weight, masks, bias, index)
    out = jax.block_until_ready(out)

    # reference check (plain JAX, full-precision matmul)
    masked = weight * masks[index].astype(jnp.float32)
    ref = lax.dot_general(x, masked,
                          dimension_numbers=(((1,), (1,)), ((), ())),
                          precision=lax.Precision.HIGHEST) + bias
    assert out.shape == (batch, out_features)
    assert jnp.allclose(out, ref, atol=1e-4, rtol=1e-4), "mismatch vs reference"

    print("KERNEL_OK")
</pallas_src>

<mosaic_0001>
module attributes {stable_mosaic.version = 11 : i64} {
  func.func @_dropconnect_linear_kernel(%arg0: i32, %arg1: i32, %arg2: i32, %arg3: memref<1xi32, #tpu.memory_space<smem>>, %arg4: memref<32x256xf32, #tpu.memory_space<vmem>>, %arg5: memref<128x256xf32, #tpu.memory_space<vmem>>, %arg6: memref<1x128x256xi8, #tpu.memory_space<vmem>>, %arg7: memref<1x128xf32, #tpu.memory_space<vmem>>, %arg8: memref<32x128xf32, #tpu.memory_space<vmem>>, %arg9: memref<32x128xf32, #tpu.memory_space<vmem>>) attributes {dimension_semantics = [#tpu.dimension_semantics<parallel>, #tpu.dimension_semantics<parallel>, #tpu.dimension_semantics<arbitrary>], iteration_bounds = array<i64: 1, 1, 2>, scalar_prefetch = 1 : i64, scratch_operands = 1 : i64, tpu.core_type = #tpu.core_type<tc>, window_params = [{transform_indices = @transform_0, window_bounds = array<i64: 32, 256>}, {transform_indices = @transform_1, window_bounds = array<i64: 128, 256>}, {transform_indices = @transform_2, window_bounds = array<i64: 1, 128, 256>}, {transform_indices = @transform_3, window_bounds = array<i64: 1, 128>}, {transform_indices = @transform_4, window_bounds = array<i64: 32, 128>}]} {
    %c0_i32 = arith.constant 0 : i32
    %0 = arith.cmpi eq, %arg2, %c0_i32 : i32
    %1 = arith.extui %0 : i1 to i32
    %c0_i32_0 = arith.constant 0 : i32
    %2 = arith.cmpi ne, %1, %c0_i32_0 : i32
    scf.if %2 {
      %cst_12 = arith.constant 0.000000e+00 : f32
      %16 = vector.broadcast %cst_12 : f32 to vector<32x128xf32>
      %c0_13 = arith.constant 0 : index
      %c0_14 = arith.constant 0 : index
      %17 = vector.load %arg9[%c0_13, %c0_14] : memref<32x128xf32, #tpu.memory_space<vmem>>, vector<32x128xf32>
      tpu.vector_store %arg9[%c0_13, %c0_14], %16 {strides = array<i32>} : memref<32x128xf32, #tpu.memory_space<vmem>>, vector<32x128xf32>,
    } else {
    }
    %c0 = arith.constant 0 : index
    %c0_1 = arith.constant 0 : index
    %3 = vector.load %arg5[%c0, %c0_1] : memref<128x256xf32, #tpu.memory_space<vmem>>, vector<128x256xf32>
    %c0_2 = arith.constant 0 : index
    %c0_3 = arith.constant 0 : index
    %c0_4 = arith.constant 0 : index
    %4 = vector.load %arg6[%c0_2, %c0_3, %c0_4] : memref<1x128x256xi8, #tpu.memory_space<vmem>>, vector<1x128x256xi8>
    %5 = vector.shape_cast %4 : vector<1x128x256xi8> to vector<128x256xi8>
    %6 = arith.sitofp %5 : vector<128x256xi8> to vector<128x256xf32>
    %7 = arith.mulf %3, %6 : vector<128x256xf32>
    %c0_5 = arith.constant 0 : index
    %c0_6 = arith.constant 0 : index
    %8 = vector.load %arg9[%c0_5, %c0_6] : memref<32x128xf32, #tpu.memory_space<vmem>>, vector<32x128xf32>
    %c0_7 = arith.constant 0 : index
    %c0_8 = arith.constant 0 : index
    %9 = vector.load %arg4[%c0_7, %c0_8] : memref<32x256xf32, #tpu.memory_space<vmem>>, vector<32x256xf32>
    %cst = arith.constant dense<0.000000e+00> : vector<32x128xf32>
    %10 = tpu.matmul %9, %7, %cst {dimension_numbers = #tpu.dot_dimension_numbers<[1], [1], [0], [0], [0, 0, 1, 0], [], []>} : vector<32x256xf32>, vector<128x256xf32>, vector<32x128xf32> -> vector<32x128xf32>
    %11 = arith.addf %8, %10 : vector<32x128xf32>
    %c0_9 = arith.constant 0 : index
    %c0_10 = arith.constant 0 : index
    %12 = vector.load %arg9[%c0_9, %c0_10] : memref<32x128xf32, #tpu.memory_space<vmem>>, vector<32x128xf32>
    tpu.vector_store %arg9[%c0_9, %c0_10], %11 {strides = array<i32>} : memref<32x128xf32, #tpu.memory_space<vmem>>, vector<32x128xf32>,
    %c1_i32 = arith.constant 1 : i32
    %13 = arith.cmpi eq, %arg2, %c1_i32 : i32
    %14 = arith.extui %13 : i1 to i32
    %c0_i32_11 = arith.constant 0 : i32
    %15 = arith.cmpi ne, %14, %c0_i32_11 : i32
    scf.if %15 {
      %c0_12 = arith.constant 0 : index
      %c0_13 = arith.constant 0 : index
      %16 = vector.load %arg9[%c0_12, %c0_13] : memref<32x128xf32, #tpu.memory_space<vmem>>, vector<32x128xf32>
      %c0_14 = arith.constant 0 : index
      %c0_15 = arith.constant 0 : index
      %17 = vector.load %arg7[%c0_14, %c0_15] : memref<1x128xf32, #tpu.memory_space<vmem>>, vector<1x128xf32>
      %18 = vector.broadcast %17 : vector<1x128xf32> to vector<32x128xf32>
      %19 = arith.addf %16, %18 : vector<32x128xf32>
      %c0_16 = arith.constant 0 : index
      %c0_17 = arith.constant 0 : index
      %20 = vector.load %arg8[%c0_16, %c0_17] : memref<32x128xf32, #tpu.memory_space<vmem>>, vector<32x128xf32>
      tpu.vector_store %arg8[%c0_16, %c0_17], %19 {strides = array<i32>} : memref<32x128xf32, #tpu.memory_space<vmem>>, vector<32x128xf32>,
    } else {
    }
    return
  }
  func.func @transform_0(%arg0: i32, %arg1: i32, %arg2: i32, %arg3: memref<1xi32, #tpu.memory_space<smem>>) -> (i32, i32) {
    %c0_i32 = arith.constant 0 : i32
    return %arg0, %arg2 : i32, i32
  }
  func.func @transform_1(%arg0: i32, %arg1: i32, %arg2: i32, %arg3: memref<1xi32, #tpu.memory_space<smem>>) -> (i32, i32) {
    %c0_i32 = arith.constant 0 : i32
    return %arg1, %arg2 : i32, i32
  }
  func.func @transform_2(%arg0: i32, %arg1: i32, %arg2: i32, %arg3: memref<1xi32, #tpu.memory_space<smem>>) -> (i32, i32, i32) {
    %c0 = arith.constant 0 : index
    %0 = memref.load %arg3[%c0] : memref<1xi32, #tpu.memory_space<smem>>
    %c0_i32 = arith.constant 0 : i32
    return %0, %arg1, %arg2 : i32, i32, i32
  }
  func.func @transform_3(%arg0: i32, %arg1: i32, %arg2: i32, %arg3: memref<1xi32, #tpu.memory_space<smem>>) -> (i32, i32) {
    %c0_i32 = arith.constant 0 : i32
    %c0_i32_0 = arith.constant 0 : i32
    return %c0_i32, %arg1 : i32, i32
  }
  func.func @transform_4(%arg0: i32, %arg1: i32, %arg2: i32, %arg3: memref<1xi32, #tpu.memory_space<smem>>) -> (i32, i32) {
    %c0_i32 = arith.constant 0 : i32
    return %arg0, %arg1 : i32, i32
  }
}

</mosaic_0001>

<bundles_post_ra>
// kernel: tpu_custom_call.1
= control target key start
LH: loop header
LB: loop body
LE: loop exit
PB: predicated region body
PF: predicated region fallthrough
CT: control target
= control target key end

     0   :  { %s1561_s0 = inlined_call_operand.<no memory space> [shape: s32[1], index: 0, kind: input, shape index: {}]   ;;  %s1562_s1 = inlined_call_operand.hbm [shape: f32[32,512], index: 1, kind: input, shape index: {}]   ;;  %s1563_s2 = inlined_call_operand.hbm [shape: f32[128,512], index: 2, kind: input, shape index: {}]   ;;  %s1564_s3 = inlined_call_operand.hbm [shape: s8[10,128,512], index: 3, kind: input, shape index: {}]   ;;  %s1565_s4 = inlined_call_operand.vmem [shape: f32[1,128], index: 4, kind: input, shape index: {}]   ;;  %s1566_s5 = inlined_call_operand.hbm [shape: f32[32,128], index: 5, kind: output, shape index: {}]  }
   0x1   :  { %1579 = sst [smem:[#allocation19_spill]] %s1563_s2 }
   0x2   :  { %10 = sst [smem:[#allocation4]] %s1561_s0 }
   0x3   :  { %11 = vsyncpa [#allocation6], 0 }
   0x4   :  { %13 = vsyncpa [#allocation6 + $0x1], 0 }
   0x5   :  { %14 = vsyncpa [#allocation9], 0 }
   0x6   :  { %16 = vsyncpa [#allocation9 + $0x1], 0 }
   0x7   :  { %17 = vsyncpa [#allocation7], 0  ;;  %s1194_s20 = smov 0   ;;  %s1196_s21 = smov 0  }
   0x8   :  { %s1198_s22 = smov 0   ;;  %s1200_s23 = smov 0  }
   0x9   :  { %s1202_s24 = smov 0   ;;  %s1204_s25 = smov 0  }
   0xa   :  { %s1206_s26 = smov 0   ;;  %s1208_s0 = smov 0  }
   0xb   :  { %s1210_s27 = smov 0  }
   0xc LB: > { %1580 = sst [smem:[#allocation16_spill]] %s1137_s25  ;;  %s1238_s28 = sadd.s32 4294967295, %s1149_s27   ;;  %s1149_s27 = sphi %s1210_s27, %s23_s27   ;;  %s1145_s0 = sphi %s1208_s0, %s1610_s0   ;;  %s1141_s26 = sphi %s1206_s26, %s1609_s26   ;;  %s1137_s25 = sphi %s1204_s25, %s1602_s25   ;;  %s1133_s24 = sphi %s1202_s24, %s1608_s24   ;;  %s1129_s23 = sphi %s1200_s23, %s1607_s23   ;;  %s1125_s22 = sphi %s1198_s22, %s1606_s22   ;;  %s1121_s21 = sphi %s1196_s21, %s1605_s21   ;;  %s1117_s20 = sphi %s1194_s20, %s1604_s20  }
   0xd   : > { %s35_s29 = sadd.s32 1, %s1145_s0  ;;  %s51_s30 = sadd.s32 1, %s1137_s25 }
   0xe   : > { %p36_p0 = scmp.ge.s32.totalorder %s35_s29, 2  ;;  %p58_p1 = scmp.ne.s32.totalorder %s1137_s25, %s1133_s24 }
   0xf   : > { %p1570_p2 = scmp.eq.s32.totalorder %s1149_s27, 0  ;;  %p64_p4 = scmp.ne.s32.totalorder %s1133_s24, %s1129_s23 }
  0x10   : > { %s1612_s29 = smov (%p36_p0, %s35_s29), 0  ;;  %p1569_p5 = scmp.eq.s32.totalorder %s1238_s28, 0 }
  0x11   : > { %1581 = sst [smem:[#allocation17_spill]] %s1612_s29  ;;  %p60_p3 = por %p1570_p2, %p58_p1 }
  0x12   : > { %s47_s6 = ssub.s32 %s1145_s0, %s1612_s29  ;;  %s1257_s8 = sld [smem:[#allocation4]] }
  0x13   : > { %p1253_p6 = scmp.eq.s32.totalorder %s47_s6, 0  ;;  %p1261_p7 = por %p1569_p5, %p64_p4 }
  0x14   : > { %p1568_p8 = scmp.lt.s32.totalorder %s1149_s27, 2  ;;  %s1272_s11 = sand.u32 1, %s1137_s25  }
  0x15   : > { %s1583_s9 = scalar_select %p1261_p7, 1, 0 }
  0x16   : > { %s1268_s10 = scalar_select %p1253_p6, %s1137_s25, %s51_s30  }
  0x17   : > { %s1567_s12 = sshll.u32 %s1145_s0, 8  ;;  %p1277_p9 = pnand %p1568_p8, %p60_p3 }
  0x18   : > { %1584 = sst [smem:[#allocation18_spill]] %s1268_s10  ;;  %s232_s14 = sand.u32 1, %s1149_s27  }
  0x19   : > { %s777_s15 = sshll.u32 %s1272_s11, 8  ;;  %s1586_s2 = sld [smem:[#allocation19_spill]] }
  0x1a   : > { %s236_s19 = scalar_lea.vmem [#allocation8], %s777_s15  ;;  %s1294_s30 = scalar_lea.sflag [#allocation9], %s232_s14 }
  0x1b   : > { %s246_s23 = sshll.u32 %s236_s19, 4  ;;  %p949_p13 = pneg %p1277_p9  ;;  %s1291_s23 = int_to_ptr.vmem [resolvable:$true] %s246_s23 }
  0x1f   : > { %s1288_s18 = scalar_lea.hbm %s1586_s2, %s1567_s12  ;;  %s952_s12 = scalar_lea.hbm %s1586_s2, 8192 }
  0x20   : > { %s947_s6 = scalar_lea.hbm %s1288_s18, 4096  ;;  %p953_p3 = scmp.lt.u32.totalorder %s1288_s18, %s1586_s2 }
  0x21   : > { %p948_p12 = scmp.ne.s32.totalorder %s1288_s18, %s947_s6  ;;  %p954_p4 = scmp.lt.u32.totalorder %s952_s12, %s947_s6 }
  0x22   : > { %p956_p5 = scmp.lt.u32.totalorder %s947_s6, %s1288_s18 }
  0x23   : > { %p950_p0 = pnand %p949_p13, %p948_p12  ;;  %p955_p8 = por %p954_p4, %p953_p3 }
  0x25   : > { %p951_p1 = pneg %p950_p0  ;;  %p957_p2 = por %p956_p5, %p955_p8 }
  0x27   : > { %p958_p10 = pnand %p957_p2, %p951_p1 }
  0x29   : > { %961 = shalt.err (!%p958_p10)
}
  0x2a   : > { %s962_s14 = scalar_lea.vmem %s1291_s23, 4096  ;;  %s1151_s16 = smov [#allocation8]  }
  0x2b   : > { %p963_p12 = scmp.ne.s32.totalorder %s1291_s23, %s962_s14  ;;  %s967_s17 = sshll.u32 %s1151_s16, 4  ;;  %s968_s17 = int_to_ptr.vmem [resolvable:$false] %s967_s17 }
  0x2c   : > { %s969_s15 = scalar_lea.vmem %s968_s17, 8192  ;;  %p970_p7 = scmp.lt.s32.totalorder %s1291_s23, %s968_s17 }
  0x2d   : > { %p965_p0 = pnand %p963_p12, %p949_p13  ;;  %p971_p3 = scmp.lt.s32.totalorder %s969_s15, %s962_s14 }
  0x2f   : > { %p966_p11 = pneg %p965_p0  ;;  %p972_p4 = por %p971_p3, %p970_p7 }
  0x31   : > { %p973_p5 = pnand %p972_p4, %p966_p11 }
  0x33   : > { %976 = shalt.err (!%p973_p5)
}
  0x34   : > { %s1574_s12 = smov 512   ;;  %s1576_s6 = smov 256  }
  0x35   : > { %s1578_s19 = smov 16   ;;  %p1587_p2 = scmp.lt.s32.totalorder %s1149_s27, 3 }
  0x36   : > { %861 = dma.hbm_to_vmem [thread:$0]  (!%p1277_p9), %s1288_s18, 4096, %s1291_s23, %s1294_s30, %s1574_s12, %s1576_s6, %s1578_s19  }
  0x37   : > { %p1588_p7 = scmp.ge.s32.totalorder %s1149_s27, 1  ;;  %s774_s16 = sshll.u32 %s1272_s11, 6 }
  0x38   : > { %s1590_s17 = sshll.u32 %s1145_s0, 8  ;;  %s212_s10 = scalar_lea.vmem [#allocation5], %s774_s16 }
  0x39   : > { %p1329_p8 = pnand %p1588_p7, %p1587_p2  ;;  %s1339_s29 = scalar_lea.hbm %s1562_s1, %s1590_s17 }
  0x3a   : > { %s222_s25 = sshll.u32 %s212_s10, 4  ;;  %s209_s18 = scalar_lea.sflag [#allocation6], %s1272_s11  ;;  %s1341_s25 = int_to_ptr.vmem [resolvable:$true] %s222_s25 }
  0x3b   : > { %s1589_s14 = scalar_select %p1329_p8, 1, 0 }
  0x3c   : > { %s977_s23 = scalar_lea.hbm %s1339_s29, 1024  ;;  %s982_s2 = scalar_lea.hbm %s1562_s1, 2048 }
  0x3d   : > { %p978_p10 = scmp.ne.s32.totalorder %s1339_s29, %s977_s23  ;;  %p983_p12 = scmp.lt.u32.totalorder %s1339_s29, %s1562_s1 }
  0x3e   : > { %p984_p0 = scmp.lt.u32.totalorder %s982_s2, %s977_s23  ;;  %p986_p4 = scmp.lt.u32.totalorder %s977_s23, %s1339_s29 }
  0x3f   : > { %p980_p11 = pnand %p978_p10, %p949_p13 }
  0x40   : > { %p985_p3 = por %p984_p0, %p983_p12 }
  0x41   : > { %p981_p1 = pneg %p980_p11 }
  0x42   : > { %p987_p5 = por %p986_p4, %p985_p3 }
  0x44   : > { %p988_p2 = pnand %p987_p5, %p981_p1 }
  0x46   : > { %991 = shalt.err (!%p988_p2)
}
  0x47   : > { %s992_s10 = scalar_lea.vmem %s1341_s25, 1024  ;;  %s1155_s12 = smov [#allocation5]  }
  0x48   : > { %p993_p7 = scmp.ne.s32.totalorder %s1341_s25, %s992_s10  ;;  %s997_s6 = sshll.u32 %s1155_s12, 4  ;;  %s998_s6 = int_to_ptr.vmem [resolvable:$false] %s997_s6 }
  0x49   : > { %s999_s16 = scalar_lea.vmem %s998_s6, 2048  ;;  %p1000_p8 = scmp.lt.s32.totalorder %s1341_s25, %s998_s6 }
  0x4a   : > { %p995_p10 = pnand %p993_p7, %p949_p13  ;;  %p1001_p12 = scmp.lt.s32.totalorder %s999_s16, %s992_s10 }
  0x4c   : > { %p996_p11 = pneg %p995_p10  ;;  %p1002_p0 = por %p1001_p12, %p1000_p8 }
  0x4e   : > { %p1003_p3 = pnand %p1002_p0, %p996_p11 }
  0x50   : > { %1006 = shalt.err (!%p1003_p3)
}
  0x51   : > { %s1591_s23 = smov 256   ;;  %s1592_s2 = smov 512  }
  0x52   : > { %858 = dma.hbm_to_vmem [thread:$0]  (!%p1277_p9), %s1339_s29, 1024, %s1341_s25, %s209_s18, %s1592_s2, %s1591_s23, %s1578_s19  }
  0x53   : > { %s111_s13 = sadd.s32 1, %s1125_s22  ;;  %p118_p13 = scmp.ne.s32.totalorder %s1125_s22, %s1121_s21 }
  0x54   : > { %s1376_s17 = scalar_select %p1253_p6, %s1125_s22, %s111_s13  }
  0x55   : > { %p124_p8 = scmp.ne.s32.totalorder %s1121_s21, %s1117_s20  ;;  %s258_s11 = sand.u32 1, %s1125_s22  }
  0x56   : > { %s781_s15 = sshll.u32 %s1145_s0, 1  ;;  %p1593_p1 = scmp.eq.s32.totalorder %s1149_s27, 0 }
  0x57   : > { %p1594_p5 = scmp.eq.s32.totalorder %s1238_s28, 0  ;;  %s780_s12 = sshll.u32 %s258_s11, 6 }
  0x58   : > { %p120_p4 = por %p118_p13, %p1593_p1  ;;  %s782_s6 = sshll.u32 %s1257_s8, 4 }
  0x59   : > { %p1388_p2 = por %p124_p8, %p1594_p5  ;;  %s270_s16 = sadd.s32 %s782_s6, %s781_s15 }
  0x5a   : > { %s783_s25 = sshll.u32 %s270_s16, 7  ;;  %s260_s29 = scalar_lea.vmem [#allocation10], %s780_s12 }
  0x5b   : > { %s273_s7 = sshll.u32 %s260_s29, 4  ;;  %s1396_s19 = scalar_lea.hbm %s1564_s3, %s783_s25  ;;  %s1398_s7 = int_to_ptr.vmem [resolvable:$true] %s273_s7 }
  0x5c   : > { %p1596_p6 = scmp.lt.s32.totalorder %s1149_s27, 2  ;;  %s1007_s8 = scalar_lea.hbm %s1396_s19, 1024 }
  0x5d   : > { %p1008_p7 = scmp.ne.s32.totalorder %s1396_s19, %s1007_s8  ;;  %s1012_s12 = scalar_lea.hbm %s1564_s3, 20480 }
  0x5e   : > { %p1402_p9 = pnand %p1596_p6, %p120_p4  ;;  %p1013_p0 = scmp.lt.u32.totalorder %s1396_s19, %s1564_s3 }
  0x5f   : > { %p1014_p3 = scmp.lt.u32.totalorder %s1012_s12, %s1007_s8  ;;  %p1016_p8 = scmp.lt.u32.totalorder %s1007_s8, %s1396_s19 }
  0x60   : > { %p1009_p10 = pneg %p1402_p9 }
  0x61   : > { %p1015_p13 = por %p1014_p3, %p1013_p0 }
  0x62   : > { %p1010_p11 = pnand %p1009_p10, %p1008_p7 }
  0x63   : > { %p1017_p1 = por %p1016_p8, %p1015_p13 }
  0x64   : > { %p1011_p12 = pneg %p1010_p11 }
  0x66   : > { %p1018_p4 = pnand %p1017_p1, %p1011_p12 }
  0x68   : > { %1021 = shalt.err (!%p1018_p4)
}
  0x69   : > { %s1022_s25 = scalar_lea.vmem %s1398_s7, 1024  ;;  %s1156_s29 = smov [#allocation10]  }
  0x6a   : > { %p1023_p5 = scmp.ne.s32.totalorder %s1398_s7, %s1022_s25  ;;  %s1027_s18 = sshll.u32 %s1156_s29, 4  ;;  %s1028_s18 = int_to_ptr.vmem [resolvable:$false] %s1027_s18 }
  0x6b   : > { %s1029_s13 = scalar_lea.vmem %s1028_s18, 2048  ;;  %p1030_p11 = scmp.lt.s32.totalorder %s1398_s7, %s1028_s18 }
  0x6c   : > { %p1025_p6 = pnand %p1023_p5, %p1009_p10  ;;  %p1031_p0 = scmp.lt.s32.totalorder %s1029_s13, %s1022_s25 }
  0x6e   : > { %p1026_p7 = pneg %p1025_p6  ;;  %p1032_p3 = por %p1031_p0, %p1030_p11 }
  0x70   : > { %p1033_p13 = pnand %p1032_p3, %p1026_p7 }
  0x72   : > { %1036 = shalt.err (!%p1033_p13)
}
  0x73   : > { %s1598_s8 = smov 16   ;;  %p1599_p10 = scmp.ne.s32.totalorder %s1589_s14, 0 }
  0x74   : > { %864 = dma.hbm_to_vmem [thread:$0]  (!%p1402_p9), %s1396_s19, 1024, %s1398_s7, %s1294_s30, %s1592_s2, %s1591_s23, %s1598_s8  }
  0x75   : > { %285 = sbr.rel (%p1599_p10) target bundleno = 469 (0x1d5), region = 36  ;;  %s287_s11 = sand.u32 (!%p1599_p10), 1, %s1133_s24  }
  0x76   : > { %s785_s15 = sshll.u32 (!%p1599_p10), %s287_s11, 6  ;;  %s288_s12 = scalar_lea.sflag (!%p1599_p10), [#allocation6], %s287_s11 }
  0x77   : > { %s1438_s6 = scalar_lea.vmem (!%p1599_p10), [#allocation5], %s785_s15  ;;  %p1600_p12 = scmp.ne.s32.totalorder (!%p1599_p10), %s1583_s9, 0 }
  0x7c   : > { %1100 = dma.done.wait (%p1600_p12), %s288_s12, 1024  }
  0x7d   : > { %1102 = vsyncadd (%p1600_p12), %s288_s12, 4294966272  ;;  %s296_s20 = sand.u32 1, %s1238_s28   ;;  %s786_s16 = sshll.u32 %s287_s11, 8 }
  0x7e   : > { %s297_s30 = scalar_lea.sflag [#allocation9], %s296_s20  ;;  %s1445_s19 = scalar_lea.vmem [#allocation8], %s786_s16 }
  0x7f   : > { %1104 = dma.done.wait (%p1600_p12), %s297_s30, 4096  }
  0x80   : > { %1106 = vsyncadd (%p1600_p12), %s297_s30, 4294963200  ;;  %s307_s14 = sand.u32 1, %s1121_s21  }
  0x81   : > { %s787_s23 = sshll.u32 %s307_s14, 6 }
  0x82   : > { %s1452_s2 = scalar_lea.vmem [#allocation10], %s787_s23 }
  0x83   : > { %1108 = dma.done.wait (%p1388_p2), %s297_s30, 1024  }
  0x84   : > { %1110 = vsyncadd (%p1388_p2), %s297_s30, 4294966272  ;;  %p788_p9 = scmp.ne.s32.totalorder %s1141_s26, 0 }
  0x85   : > { %v1157_v0 = vmov (!%p788_p9), 0.0  }
  0x86   : > { %356 = sbr.rel (%p788_p9) target bundleno = 141 (0x8d), region = 52  ;;  %357 = vst [vmem:[#allocation2] sm:$0xff] (!%p788_p9), %v1157_v0  ;;  %358 = vst [vmem:[#allocation2 + $0x8] sm:$0xff] (!%p788_p9), %v1157_v0 }
  0x87   : > { %359 = vst [vmem:[#allocation2 + $0x10] sm:$0xff] (!%p788_p9), %v1157_v0  ;;  %360 = vst [vmem:[#allocation2 + $0x18] sm:$0xff] (!%p788_p9), %v1157_v0 }
  0x8d PF: > { %v394_v1 = vld [vmem:[%s1452_s2 + $0x8] sm:$0xff]  ;;  %v393_v5 = vld [vmem:[%s1452_s2] sm:$0xff]  ;;  %v364_v8 = vld [vmem:[%s1445_s19 + $0x18] sm:$0xff]  ;;  %p789_p2 = scmp.ne.s32.totalorder %s1141_s26, 1 }
  0x8e   : > { %v362_v2 = vld [vmem:[%s1445_s19 + $0x8] sm:$0xff]  ;;  %v402_v3 = vunpack.c.0.s8 %v394_v1  ;;  %v404_v4 = vunpack.c.1.s8 %v394_v1  ;;  %v406_v6 = vunpack.c.2.s8 %v394_v1  ;;  %v408_v7 = vunpack.c.3.s8 %v394_v1  ;;  %v368_v12 = vld [vmem:[%s1445_s19 + $0x38] sm:$0xff]  ;;  %v361_v17 = vld [vmem:[%s1445_s19] sm:$0xff] }
  0x8f   : > { %v401_v9 = vunpack.c.0.s8 %v393_v5  ;;  %v403_v10 = vunpack.c.1.s8 %v393_v5  ;;  %v366_v11 = vld [vmem:[%s1445_s19 + $0x28] sm:$0xff]  ;;  %v405_v13 = vunpack.c.2.s8 %v393_v5  ;;  %v407_v14 = vunpack.c.3.s8 %v393_v5  ;;  %v363_v18 = vld [vmem:[%s1445_s19 + $0x10] sm:$0xff]  ;;  %v396_v23 = vld [vmem:[%s1452_s2 + $0x18] sm:$0xff] }
  0x90   : > { %v434_v15 = vcvt.s32.f32 %v402_v3  ;;  %v436_v16 = vcvt.s32.f32 %v404_v4  ;;  %v438_v19 = vcvt.s32.f32 %v406_v6  ;;  %v440_v20 = vcvt.s32.f32 %v408_v7  ;;  %v365_v34 = vld [vmem:[%s1445_s19 + $0x20] sm:$0xff]  ;;  %v367_v35 = vld [vmem:[%s1445_s19 + $0x30] sm:$0xff]  ;;  %v370_v40 = vld [vmem:[%s1445_s19 + $0x48] sm:$0xff] }
  0x91   : > { %v433_v21 = vcvt.s32.f32 %v401_v9  ;;  %v435_v22 = vcvt.s32.f32 %v403_v10  ;;  %v437_v30 = vcvt.s32.f32 %v405_v13  ;;  %v439_v31 = vcvt.s32.f32 %v407_v14  ;;  %v395_v38 = vld [vmem:[%s1452_s2 + $0x10] sm:$0xff]  ;;  %v372_v41 = vld [vmem:[%s1445_s19 + $0x58] sm:$0xff]  ;;  %v502_v52 = vld [vmem:[%s1438_s6 + $0x8] sm:$0xff] }
  0x92   : > { %v466_v24 = vmul.f32 %v434_v15, %v362_v2  ;;  %v468_v25 = vmul.f32 %v436_v16, %v364_v8  ;;  %v470_v26 = vmul.f32 %v438_v19, %v366_v11  ;;  %v472_v27 = vmul.f32 %v440_v20, %v368_v12  ;;  %v506_v53 = vld [vmem:[%s1438_s6 + $0x28] sm:$0xff]  ;;  %573 = vmatprep.mubr.f32.mxu0 %v502_v52  ;;  %v369_v58 = vld [vmem:[%s1445_s19 + $0x40] sm:$0xff]  ;;  %v371_v59 = vld [vmem:[%s1445_s19 + $0x50] sm:$0xff] }
  0x93   : > { %v465_v28 = vmul.f32 %v433_v21, %v361_v17  ;;  %v467_v29 = vmul.f32 %v435_v22, %v363_v18  ;;  %v410_v36 = vunpack.c.0.s8 %v396_v23  ;;  %v412_v37 = vunpack.c.1.s8 %v396_v23  ;;  %583 = vmatprep.mubr.f32.mxu1 %v506_v53  ;;  %v374_v62 = vld [vmem:[%s1445_s19 + $0x68] sm:$0xff]  ;;  %v376_v63 = vld [vmem:[%s1445_s19 + $0x78] sm:$0xff]  ;;  %v373_v13 = vld [vmem:[%s1445_s19 + $0x60] sm:$0xff] }
  0x94   : > { %v797_v32 = vpack.c.bf16 %v468_v25, %v466_v24  ;;  %v801_v33 = vpack.c.bf16 %v472_v27, %v470_v26  ;;  %v469_v44 = vmul.f32 %v437_v30, %v365_v34  ;;  %v471_v45 = vmul.f32 %v439_v31, %v367_v35  ;;  %v398_v0 = vld [vmem:[%s1452_s2 + $0x28] sm:$0xff]  ;;  %v375_v14 = vld [vmem:[%s1445_s19 + $0x70] sm:$0xff]  ;;  %v397_v17 = vld [vmem:[%s1452_s2 + $0x20] sm:$0xff] }
  0x95   : > { %v799_v39 = vpack.c.bf16 %v467_v29, %v465_v28  ;;  %v442_v42 = vcvt.s32.f32 %v410_v36  ;;  %v444_v43 = vcvt.s32.f32 %v412_v37  ;;  %v409_v46 = vunpack.c.0.s8 %v395_v38  ;;  %v378_v18 = vld [vmem:[%s1445_s19 + $0x88] sm:$0xff]  ;;  %v380_v19 = vld [vmem:[%s1445_s19 + $0x98] sm:$0xff]  ;;  %v383_v52 = vld [vmem:[%s1445_s19 + $0xb0] sm:$0xff] }
  0x96   : > { %798 = vmatprep.subr.bf16.mxu0 %v797_v32  ;;  %829 = vmatprep.subr.bf16.mxu1 %v797_v32  ;;  %v411_v47 = vunpack.c.1.s8 %v395_v38  ;;  %v414_v50 = vunpack.c.2.s8 %v396_v23  ;;  %v416_v51 = vunpack.c.3.s8 %v396_v23  ;;  %v803_v54 = vpack.c.bf16 %v471_v45, %v469_v44  ;;  %v377_v32 = vld [vmem:[%s1445_s19 + $0x80] sm:$0xff]  ;;  %v382_v36 = vld [vmem:[%s1445_s19 + $0xa8] sm:$0xff]  ;;  %v384_v37 = vld [vmem:[%s1445_s19 + $0xb8] sm:$0xff] }
  0x97   : > { %800 = vmatpush1.bf16.xpose.msra.mxu0 %v799_v39  ;;  %837 = vmatpush1.bf16.xpose.msra.mxu1 %v799_v39  ;;  %v474_v48 = vmul.f32 %v442_v42, %v370_v40  ;;  %v476_v49 = vmul.f32 %v444_v43, %v372_v41  ;;  %v441_v55 = vcvt.s32.f32 %v409_v46  ;;  %v413_v3 = vunpack.c.2.s8 %v395_v38 }
  0x98   : > { %802 = vmatprep.subr.bf16.mxu0 %v801_v33  ;;  %830 = vmatprep.subr.bf16.mxu1 %v801_v33  ;;  %v443_v56 = vcvt.s32.f32 %v411_v47  ;;  %v446_v60 = vcvt.s32.f32 %v414_v50  ;;  %v448_v61 = vcvt.s32.f32 %v416_v51  ;;  %v415_v4 = vunpack.c.3.s8 %v395_v38  ;;  %v379_v33 = vld [vmem:[%s1445_s19 + $0x90] sm:$0xff]  ;;  %v400_v38 = vld [vmem:[%s1452_s2 + $0x38] sm:$0xff]  ;;  %v381_v51 = vld [vmem:[%s1445_s19 + $0xa0] sm:$0xff] }
  0x99   : > { %v805_v57 = vpack.c.bf16 %v476_v49, %v474_v48  ;;  %v473_v1 = vmul.f32 %v441_v55, %v369_v58  ;;  %v418_v7 = vunpack.c.0.s8 %v398_v0  ;;  %v420_v8 = vunpack.c.1.s8 %v398_v0  ;;  %v399_v55 = vld [vmem:[%s1452_s2 + $0x30] sm:$0xff] }
  0x9a   : > { %v475_v2 = vmul.f32 %v443_v56, %v371_v59  ;;  %v478_v5 = vmul.f32 %v446_v60, %v374_v62  ;;  %v480_v6 = vmul.f32 %v448_v61, %v376_v63  ;;  %v445_v10 = vcvt.s32.f32 %v413_v3  ;;  %v386_v56 = vld [vmem:[%s1445_s19 + $0xc8] sm:$0xff] }
  0x9b   : > { %v447_v11 = vcvt.s32.f32 %v415_v4  ;;  %v450_v15 = vcvt.s32.f32 %v418_v7  ;;  %v452_v16 = vcvt.s32.f32 %v420_v8  ;;  %v417_v22 = vunpack.c.0.s8 %v397_v17  ;;  %v387_v7 = vld [vmem:[%s1445_s19 + $0xd0] sm:$0xff] }
  0x9c   : > { %v807_v9 = vpack.c.bf16 %v475_v2, %v473_v1  ;;  %v809_v12 = vpack.c.bf16 %v480_v6, %v478_v5  ;;  %v477_v20 = vmul.f32 %v445_v10, %v373_v13  ;;  %v419_v23 = vunpack.c.1.s8 %v397_v17  ;;  %v385_v6 = vld [vmem:[%s1445_s19 + $0xc0] sm:$0xff]  ;;  %v390_v10 = vld [vmem:[%s1445_s19 + $0xe8] sm:$0xff] }
  0x9d   : > { %v479_v21 = vmul.f32 %v447_v11, %v375_v14  ;;  %v482_v24 = vmul.f32 %v450_v15, %v378_v18  ;;  %v484_v25 = vmul.f32 %v452_v16, %v380_v19  ;;  %v422_v26 = vunpack.c.2.s8 %v398_v0  ;;  %v392_v11 = vld [vmem:[%s1445_s19 + $0xf8] sm:$0xff] }
  0x9e   : > { %v424_v27 = vunpack.c.3.s8 %v398_v0  ;;  %v449_v29 = vcvt.s32.f32 %v417_v22  ;;  %v451_v30 = vcvt.s32.f32 %v419_v23  ;;  %v421_v41 = vunpack.c.2.s8 %v397_v17  ;;  %v389_v22 = vld [vmem:[%s1445_s19 + $0xe0] sm:$0xff]  ;;  %v391_v23 = vld [vmem:[%s1445_s19 + $0xf0] sm:$0xff] }
  0x9f   : > { %804 = vmatpush1.bf16.xpose.msra.mxu0 %v803_v54  ;;  %838 = vmatpush1.bf16.xpose.msra.mxu1 %v803_v54  ;;  %v811_v28 = vpack.c.bf16 %v479_v21, %v477_v20  ;;  %v813_v31 = vpack.c.bf16 %v484_v25, %v482_v24  ;;  %v454_v34 = vcvt.s32.f32 %v422_v26  ;;  %v423_v42 = vunpack.c.3.s8 %v397_v17 }
  0xa0   : > { %806 = vmatprep.subr.bf16.mxu0 %v805_v57  ;;  %831 = vmatprep.subr.bf16.mxu1 %v805_v57  ;;  %v456_v35 = vcvt.s32.f32 %v424_v27  ;;  %v481_v39 = vmul.f32 %v449_v29, %v377_v32  ;;  %v483_v40 = vmul.f32 %v451_v30, %v379_v33  ;;  %v426_v45 = vunpack.c.0.s8 %v400_v38  ;;  %v388_v57 = vld [vmem:[%s1445_s19 + $0xd8] sm:$0xff]  ;;  %v501_v27 = vld [vmem:[%s1438_s6] sm:$0xff]  ;;  %v507_v32 = vld [vmem:[%s1438_s6 + $0x30] sm:$0xff] }
  0xa1   : > { %v486_v43 = vmul.f32 %v454_v34, %v382_v36  ;;  %v428_v46 = vunpack.c.1.s8 %v400_v38  ;;  %v453_v48 = vcvt.s32.f32 %v421_v41  ;;  %v455_v49 = vcvt.s32.f32 %v423_v42  ;;  %v504_v29 = vld [vmem:[%s1438_s6 + $0x18] sm:$0xff]  ;;  %v497_v33 = vld [vmem:[#allocation2] sm:$0xff]  ;;  %v499_v34 = vld [vmem:[#allocation2 + $0x10] sm:$0xff] }
  0xa2   : > { %v488_v44 = vmul.f32 %v456_v35, %v384_v37  ;;  %v815_v47 = vpack.c.bf16 %v483_v40, %v481_v39  ;;  %v458_v53 = vcvt.s32.f32 %v426_v45  ;;  %v425_v60 = vunpack.c.0.s8 %v399_v55  ;;  %v508_v30 = vld [vmem:[%s1438_s6 + $0x38] sm:$0xff]  ;;  %v498_v41 = vld [vmem:[#allocation2 + $0x8] sm:$0xff] }
  0xa3   : > { %v460_v54 = vcvt.s32.f32 %v428_v46  ;;  %v485_v58 = vmul.f32 %v453_v48, %v381_v51  ;;  %v487_v59 = vmul.f32 %v455_v49, %v383_v52  ;;  %v427_v61 = vunpack.c.1.s8 %v399_v55  ;;  %v500_v42 = vld [vmem:[#allocation2 + $0x18] sm:$0xff] }
  0xa4   : > { %v817_v50 = vpack.c.bf16 %v488_v44, %v486_v43  ;;  %v490_v62 = vmul.f32 %v458_v53, %v386_v56  ;;  %v430_v0 = vunpack.c.2.s8 %v400_v38  ;;  %v432_v1 = vunpack.c.3.s8 %v400_v38 }
  0xa5   : > { %v492_v63 = vmul.f32 %v460_v54, %v388_v57  ;;  %v819_v2 = vpack.c.bf16 %v487_v59, %v485_v58  ;;  %v457_v3 = vcvt.s32.f32 %v425_v60  ;;  %v459_v4 = vcvt.s32.f32 %v427_v61 }
  0xa6   : > { %v462_v8 = vcvt.s32.f32 %v430_v0  ;;  %v429_v14 = vunpack.c.2.s8 %v399_v55  ;;  %v431_v15 = vunpack.c.3.s8 %v399_v55 }
  0xa7   : > { %808 = vmatpush1.bf16.xpose.msra.mxu0 %v807_v9  ;;  %839 = vmatpush1.bf16.xpose.msra.mxu1 %v807_v9  ;;  %v821_v5 = vpack.c.bf16 %v492_v63, %v490_v62  ;;  %v464_v9 = vcvt.s32.f32 %v432_v1  ;;  %v491_v13 = vmul.f32 %v459_v4, %v387_v7 }
  0xa8   : > { %810 = vmatprep.subr.bf16.mxu0 %v809_v12  ;;  %832 = vmatprep.subr.bf16.mxu1 %v809_v12  ;;  %v489_v12 = vmul.f32 %v457_v3, %v385_v6  ;;  %v494_v16 = vmul.f32 %v462_v8, %v390_v10  ;;  %v461_v19 = vcvt.s32.f32 %v429_v14  ;;  %v463_v20 = vcvt.s32.f32 %v431_v15 }
  0xa9   : > { %v496_v17 = vmul.f32 %v464_v9, %v392_v11 }
  0xaa   : > { %v823_v18 = vpack.c.bf16 %v491_v13, %v489_v12  ;;  %v493_v24 = vmul.f32 %v461_v19, %v389_v22  ;;  %v495_v25 = vmul.f32 %v463_v20, %v391_v23 }
  0xab   : > { %v825_v21 = vpack.c.bf16 %v496_v17, %v494_v16 }
  0xac   : > { %v827_v26 = vpack.c.bf16 %v495_v25, %v493_v24 }
  0xaf   : > { %812 = vmatpush1.bf16.xpose.msra.mxu0 %v811_v28  ;;  %840 = vmatpush1.bf16.xpose.msra.mxu1 %v811_v28  ;;  %v505_v28 = vld [vmem:[%s1438_s6 + $0x20] sm:$0xff] }
  0xb0   : > { %814 = vmatprep.subr.bf16.mxu0 %v813_v31  ;;  %833 = vmatprep.subr.bf16.mxu1 %v813_v31  ;;  %v503_v31 = vld [vmem:[%s1438_s6 + $0x10] sm:$0xff] }
  0xb7   : > { %816 = vmatpush1.bf16.xpose.msra.mxu0 %v815_v47  ;;  %841 = vmatpush1.bf16.xpose.msra.mxu1 %v815_v47 }
  0xb8   : > { %818 = vmatprep.subr.bf16.mxu0 %v817_v50  ;;  %834 = vmatprep.subr.bf16.mxu1 %v817_v50  ;;  %v790_v50 = vld [vmem:[%s1565_s4] ss:$0 sm:$0xff] (!%p789_p2) }
  0xbf   : > { %820 = vmatpush1.bf16.xpose.msra.mxu0 %v819_v2  ;;  %842 = vmatpush1.bf16.xpose.msra.mxu1 %v819_v2 }
  0xc0   : > { %822 = vmatprep.subr.bf16.mxu0 %v821_v5  ;;  %835 = vmatprep.subr.bf16.mxu1 %v821_v5 }
  0xc7   : > { %824 = vmatpush1.bf16.xpose.msra.mxu0 %v823_v18  ;;  %843 = vmatpush1.bf16.xpose.msra.mxu1 %v823_v18 }
  0xc8   : > { %826 = vmatprep.subr.bf16.mxu0 %v825_v21  ;;  %836 = vmatprep.subr.bf16.mxu1 %v825_v21 }
  0xcf   : > { %828 = vmatpush1.bf16.xpose.msra.mxu0 %v827_v26  ;;  %844 = vmatpush1.bf16.xpose.msra.mxu1 %v827_v26 }
  0xd6   : > { %574 = vmatmul.mubr.f32.vlgmr.msra.gmra.mrb[0].mxu0 %v501_v27  ;;  %584 = vmatmul.mubr.f32.vlgmr.msra.gmra.mrb[0].mxu1 %v505_v28 }
  0xd7   : > { %578 = vmatprep.mubr.f32.mxu0 %v504_v29  ;;  %588 = vmatprep.mubr.f32.mxu1 %v508_v30 }
  0xda   : > { %579 = vmatmul.mubr.f32.gmra.mrb[2].mxu0 %v503_v31  ;;  %589 = vmatmul.mubr.f32.gmra.mrb[2].mxu1 %v507_v32 }
 0x1a9   : > { %v575_v35 = vpop.f32.mrb[0].mxu0  ;;  %v585_v36 = vpop.f32.mrb[0].mxu1 }
 0x1aa   : > { %v594_v37 = vadd.f32 %v575_v35, %v497_v33  ;;  %v596_v38 = vadd.f32 %v585_v36, %v499_v34  ;;  %v577_v39 = vpop.f32.mrb[1].mxu0  ;;  %v587_v40 = vpop.f32.mrb[1].mxu1  ;;  %605 = sbr.rel (%p789_p2) target bundleno = 443 (0x1bb), region = 56 }
 0x1ac   : > { %598 = vst [vmem:[#allocation2] sm:$0xff] %v594_v37  ;;  %600 = vst [vmem:[#allocation2 + $0x10] sm:$0xff] %v596_v38 }
 0x1ad   : > { %v580_v43 = vpop.f32.mrb[2].mxu0  ;;  %v590_v44 = vpop.f32.mrb[2].mxu1 }
 0x1ae   : > { %v595_v45 = vadd.f32 %v580_v43, %v498_v41  ;;  %v597_v46 = vadd.f32 %v590_v44, %v500_v42  ;;  %v582_v47 = vpop.f32.mrb[3].mxu0  ;;  %v592_v48 = vpop.f32.mrb[3].mxu1 }
 0x1b0   : > { %599 = vst [vmem:[#allocation2 + $0x8] sm:$0xff] %v595_v45  ;;  %601 = vst [vmem:[#allocation2 + $0x18] sm:$0xff] %v597_v46 }
 0x1b3   : > { %v606_v49 = vld [vmem:[#allocation2] sm:$0xff]  ;;  %v608_v54 = vld [vmem:[#allocation2 + $0x10] sm:$0xff] }
 0x1b4   : > { %v617_v52 = vadd.f32 %v790_v50, %v606_v49  ;;  %v619_v56 = vadd.f32 %v790_v50, %v608_v54 }
 0x1b6   : > { %621 = vst [vmem:[#allocation11] sm:$0xff] %v617_v52  ;;  %623 = vst [vmem:[#allocation11 + $0x10] sm:$0xff] %v619_v56 }
 0x1b7   : > { %v607_v51 = vld [vmem:[#allocation2 + $0x8] sm:$0xff]  ;;  %v609_v55 = vld [vmem:[#allocation2 + $0x18] sm:$0xff] }
 0x1b8   : > { %v618_v53 = vadd.f32 %v790_v50, %v607_v51  ;;  %v620_v57 = vadd.f32 %v790_v50, %v609_v55 }
 0x1ba   : > { %622 = vst [vmem:[#allocation11 + $0x8] sm:$0xff] %v618_v53  ;;  %624 = vst [vmem:[#allocation11 + $0x18] sm:$0xff] %v620_v57 }
 0x1bb PF: > { %p866_p8 = scmp.eq.s32.totalorder %s1238_s28, 1  ;;  %s1158_s26 = smov [#allocation11]  }
 0x1bc   : > { %s635_s7 = sshll.u32 %s1158_s26, 4  ;;  %s636_s7 = int_to_ptr.vmem [resolvable:$true] %s635_s7 }
 0x1bd   : > { %s1037_s25 = scalar_lea.vmem %s636_s7, 512  ;;  %p1044_p6 = scmp.lt.s32.totalorder %s636_s7, %s636_s7 }
 0x1be   : > { %p1038_p1 = scmp.ne.s32.totalorder %s636_s7, %s1037_s25  ;;  %p1045_p7 = scmp.lt.s32.totalorder %s1037_s25, %s1037_s25 }
 0x1c0   : > { %p1039_p4 = pnand %p1038_p1, %p866_p8  ;;  %p1046_p11 = por %p1045_p7, %p1044_p6 }
 0x1c2   : > { %p1040_p5 = pneg %p1039_p4 }
 0x1c4   : > { %p1047_p0 = pnand %p1046_p11, %p1040_p5 }
 0x1c6   : > { %1050 = shalt.err (!%p1047_p0)
}
 0x1c7   : > { %s1051_s13 = scalar_lea.hbm %s1566_s5, 512 }
 0x1c8   : > { %p1052_p3 = scmp.ne.s32.totalorder %s1566_s5, %s1051_s13  ;;  %p1057_p12 = scmp.lt.u32.totalorder %s1051_s13, %s1566_s5 }
 0x1ca   : > { %p1053_p13 = pnand %p1052_p3, %p866_p8 }
 0x1cc   : > { %p1054_p10 = pneg %p1053_p13 }
 0x1ce   : > { %p1059_p9 = pnand %p1057_p12, %p1054_p10 }
 0x1d0   : > { %1062 = shalt.err (!%p1059_p9)
}
 0x1d1   : > { %s1159_s6 = smov 128   ;;  %s1160_s20 = smov 8  }
 0x1d2   : > { %852 = dma.vmem_to_hbm [thread:$0]  (%p866_p8), %s636_s7, 512, %s1566_s5, [#allocation7], %s1159_s6, %s1159_s6, %s1160_s20  }
 0x1d3   : > { %1112 = dma.done.wait (%p866_p8), [#allocation7], 512  }
 0x1d4   : > { %1114 = vsyncadd (%p866_p8), [#allocation7], 4294966784 }
 0x1d5 PF: > { %s23_s27 = sadd.s32 1, %s1149_s27   ;;  %s1601_s19 = sld [smem:[#allocation16_spill]] }
 0x1d6   : > { %p20_p2 = scmp.ge.s32.totalorder %s23_s27, 4   ;;  %s1602_s25 = sld [smem:[#allocation18_spill]] }
 0x1d7   : > { %s1603_s14 = sld [smem:[#allocation17_spill]]  ;;  %s1604_s20 = smov %s1121_s21 }
 0x1d8   : > { %s1605_s21 = smov %s1125_s22  ;;  %s1606_s22 = smov %s1376_s17 }
 0x1d9   : > { %s1607_s23 = smov %s1133_s24  ;;  %s1609_s26 = smov %s1145_s0 }
 0x1da   :  { %22 = sbr.rel (!%p20_p2) target bundleno = 12 (0xc), region = 109 }
 0x1db   : > { %s1608_s24 = smov %s1601_s19 }
 0x1dd   : > { %s1610_s0 = smov %s1603_s14 }
 0x1e1   :  { %651 = vsyncpa [#allocation6], 1 }
 0x1e2   :  { %653 = vsyncpa [#allocation6 + $0x1], 1 }
 0x1e3   :  { %654 = vsyncpa [#allocation9], 1 }
 0x1e4   :  { %656 = vsyncpa [#allocation9 + $0x1], 1 }
 0x1e5   :  { %657 = vsyncpa [#allocation7], 1 }
 0x1e6   :  { %659 = vsyncpa [#allocation7 + $0x1], 1 }

</bundles_post_ra>
